<compile_context>
chip_gen: v7x
topology: tpu7x:2x2x1
jax: 0.10.0
libtpu: 0.0.40
codegen_flags: <defaults>
</compile_context>

<pallas_src>
import functools

import jax
import jax.numpy as jnp
from jax import lax
from jax.experimental import pallas as pl
from jax.experimental.pallas import tpu as pltpu

_LANES = 128
_SUBLANES = 8


def _round_up(x, m):
    return ((x + m - 1) // m) * m


def _flatten_pad_2d(x, rows):
    """Flatten to 1D, zero-pad to rows*128 elements, reshape to (rows, 128)."""
    flat = x.reshape(-1)
    pad = rows * _LANES - flat.shape[0]
    if pad:
        flat = jnp.pad(flat, (0, pad))
    return flat.reshape(rows, _LANES)


# --------------------------------------------------------------------------
# Kernel 1: tiled L1 reductions for the two mel losses.
# --------------------------------------------------------------------------
def _mel_l1_kernel(mel_out_ref, mel_post_ref, mel_tgt_ref, out_ref, acc_ref):
    t = pl.program_id(1)  # reduction axis (arbitrary)

    @pl.when(t == 0)
    def _():
        acc_ref[...] = jnp.zeros_like(acc_ref)

    # In-kernel casts (inputs arrive in native dtype; accumulate in f32).
    tgt = mel_tgt_ref[...].astype(jnp.float32)
    d_mel = jnp.abs(mel_out_ref[...].astype(jnp.float32) - tgt)
    d_post = jnp.abs(mel_post_ref[...].astype(jnp.float32) - tgt)

    # Per-lane partial sums; the cross-lane reduce happens once per chunk.
    acc_ref[0:1, :] += jnp.sum(d_mel, axis=0, keepdims=True)
    acc_ref[1:2, :] += jnp.sum(d_post, axis=0, keepdims=True)

    @pl.when(t == pl.num_programs(1) - 1)
    def _():
        mel_sum = jnp.sum(acc_ref[0:1, :])
        post_sum = jnp.sum(acc_ref[1:2, :])
        lane = lax.broadcasted_iota(jnp.int32, (_SUBLANES, _LANES), 1)
        # lane 0 = sum|mel_out - tgt|, lane 1 = sum|mel_post - tgt|.
        out_ref[...] = jnp.where(lane == 0, mel_sum,
                                 jnp.where(lane == 1, post_sum, 0.0))


def _mel_l1_sums(mel_output, mel_postnet, mel_target):
    n = mel_output.size  # static (B*T*M)

    rows_min = _round_up(pl.cdiv(n, _LANES), _SUBLANES)
    num_chunks = 2                          # feeds both TCs on v7x
    tile_r = min(512, rows_min)             # 512x128 f32 = 256 KiB per tensor
    rows_padded = _round_up(rows_min, num_chunks * tile_r)
    tiles_per_chunk = rows_padded // (num_chunks * tile_r)

    mo = _flatten_pad_2d(mel_output, rows_padded)
    mp = _flatten_pad_2d(mel_postnet, rows_padded)
    mt = _flatten_pad_2d(mel_target, rows_padded)

    def mel_idx(c, t):
        return (c * tiles_per_chunk + t, 0)

    partials = pl.pallas_call(
        _mel_l1_kernel,
        out_shape=jax.ShapeDtypeStruct((num_chunks * _SUBLANES, _LANES),
                                       jnp.float32),
        grid=(num_chunks, tiles_per_chunk),
        in_specs=[
            pl.BlockSpec((tile_r, _LANES), mel_idx),
            pl.BlockSpec((tile_r, _LANES), mel_idx),
            pl.BlockSpec((tile_r, _LANES), mel_idx),
        ],
        out_specs=pl.BlockSpec((_SUBLANES, _LANES), lambda c, t: (c, 0)),
        scratch_shapes=[pltpu.VMEM((_SUBLANES, _LANES), jnp.float32)],
        compiler_params=pltpu.CompilerParams(
            dimension_semantics=("parallel", "arbitrary")),
    )(mo, mp, mt)

    p = partials.reshape(num_chunks, _SUBLANES, _LANES)
    mel_sum = jnp.sum(p[:, 0, 0])
    post_sum = jnp.sum(p[:, 0, 1])
    return mel_sum, post_sum


# --------------------------------------------------------------------------
# Kernel 2: tiny BCE-with-logits sum for the stop tokens (masked padding).
# --------------------------------------------------------------------------
def _stop_bce_kernel(x_ref, y_ref, out_ref, *, n_valid):
    x = x_ref[...].astype(jnp.float32)
    y = y_ref[...].astype(jnp.float32)

    rows = lax.broadcasted_iota(jnp.int32, x.shape, 0)
    lanes = lax.broadcasted_iota(jnp.int32, x.shape, 1)
    idx = rows * x.shape[1] + lanes

    # Numerically-stable BCE-with-logits (PyTorch formulation):
    #   l(x, y) = max(x, 0) - x*y + log(1 + exp(-|x|))
    bce = jnp.maximum(x, 0.0) - x * y + jnp.log1p(jnp.exp(-jnp.abs(x)))
    bce = jnp.where(idx < n_valid, bce, 0.0)
    s = jnp.sum(bce)

    lane = lax.broadcasted_iota(jnp.int32, (_SUBLANES, _LANES), 1)
    out_ref[...] = jnp.where(lane == 0, s, 0.0)


def _stop_bce_sum(stop_logits, stop_target):
    n = stop_logits.size  # static (B*T)
    rows = _round_up(pl.cdiv(n, _LANES), _SUBLANES)

    x2d = _flatten_pad_2d(stop_logits, rows)
    y2d = _flatten_pad_2d(stop_target, rows)

    out = pl.pallas_call(
        functools.partial(_stop_bce_kernel, n_valid=n),
        out_shape=jax.ShapeDtypeStruct((_SUBLANES, _LANES), jnp.float32),
        grid=(1,),
        in_specs=[
            pl.BlockSpec((rows, _LANES), lambda i: (0, 0)),
            pl.BlockSpec((rows, _LANES), lambda i: (0, 0)),
        ],
        out_specs=pl.BlockSpec((_SUBLANES, _LANES), lambda i: (0, 0)),
        compiler_params=pltpu.CompilerParams(
            dimension_semantics=("arbitrary",)),
    )(x2d, y2d)
    return out[0, 0]


# --------------------------------------------------------------------------
# Wrapper: StutterTTSLoss.forward
# --------------------------------------------------------------------------
def stutter_tts_loss(mel_output, mel_postnet, stop_tokens, mel_target,
                     stop_target, *, mel_loss_weight, postnet_mel_loss_weight,
                     stop_token_loss_weight):
    """JAX/Pallas equivalent of StutterTTSLoss.forward."""
    B, T, M = mel_output.shape

    stop_logits = jnp.squeeze(stop_tokens, axis=-1)          # (B, T)
    if not jnp.issubdtype(stop_target.dtype, jnp.floating):  # stop_target.float()
        stop_target = stop_target.astype(jnp.float32)

    mel_sum, post_sum = _mel_l1_sums(mel_output, mel_postnet, mel_target)
    stop_sum = _stop_bce_sum(stop_logits, stop_target)

    n_mel = jnp.float32(B * T * M)
    n_stop = jnp.float32(B * T)

    mel_loss = mel_sum / n_mel
    postnet_mel_loss = post_sum / n_mel
    stop_loss = stop_sum / n_stop

    total_loss = (mel_loss_weight * mel_loss
                  + postnet_mel_loss_weight * postnet_mel_loss
                  + stop_token_loss_weight * stop_loss)

    # TODO(synk): PyTorch's .item() forces device->host syncs; here loss_dict
    # holds JAX scalars so the whole loss stays jit-compatible.
    loss_dict = {
        'mel_loss': mel_loss,
        'postnet_mel_loss': postnet_mel_loss,
        'stop_loss': stop_loss,
        'total_loss': total_loss,
    }
    return total_loss, loss_dict


if __name__ == "__main__":
    # Deterministic "config" (module __init__ only stores these weights).
    config = {
        'loss': {
            'mel_loss_weight': 1.0,
            'postnet_mel_loss_weight': 1.0,
            'stop_token_loss_weight': 0.5,
        }
    }

    B, T, M = 2, 16, 32
    key = jax.random.PRNGKey(0)
    k1, k2, k3, k4, k5 = jax.random.split(key, 5)

    mel_output = jax.random.normal(k1, (B, T, M), dtype=jnp.float32)
    mel_postnet = jax.random.normal(k2, (B, T, M), dtype=jnp.float32)
    mel_target = jax.random.normal(k3, (B, T, M), dtype=jnp.float32)
    stop_tokens = jax.random.normal(k4, (B, T, 1), dtype=jnp.float32)
    stop_target = (jax.random.uniform(k5, (B, T)) > 0.5).astype(jnp.float32)

    loss_fn = jax.jit(functools.partial(
        stutter_tts_loss,
        mel_loss_weight=config['loss']['mel_loss_weight'],
        postnet_mel_loss_weight=config['loss']['postnet_mel_loss_weight'],
        stop_token_loss_weight=config['loss']['stop_token_loss_weight'],
    ))

    total_loss, loss_dict = loss_fn(mel_output, mel_postnet, stop_tokens,
                                    mel_target, stop_target)
    jax.block_until_ready(total_loss)

    # Sanity check against a pure-JAX reference.
    mel_loss_ref = jnp.mean(jnp.abs(mel_output - mel_target))
    post_loss_ref = jnp.mean(jnp.abs(mel_postnet - mel_target))
    x = jnp.squeeze(stop_tokens, -1)
    y = stop_target
    bce_ref = jnp.mean(jnp.maximum(x, 0.0) - x * y
                       + jnp.log1p(jnp.exp(-jnp.abs(x))))
    total_ref = (config['loss']['mel_loss_weight'] * mel_loss_ref
                 + config['loss']['postnet_mel_loss_weight'] * post_loss_ref
                 + config['loss']['stop_token_loss_weight'] * bce_ref)

    assert jnp.allclose(total_loss, total_ref, rtol=1e-5, atol=1e-5)
    assert jnp.allclose(loss_dict['mel_loss'], mel_loss_ref, rtol=1e-5, atol=1e-5)
    assert jnp.allclose(loss_dict['postnet_mel_loss'], post_loss_ref, rtol=1e-5, atol=1e-5)
    assert jnp.allclose(loss_dict['stop_loss'], bce_ref, rtol=1e-5, atol=1e-5)

    print("KERNEL_OK")
</pallas_src>

<mosaic_0001>
module attributes {stable_mosaic.version = 11 : i64} {
  func.func @_mel_l1_kernel(%arg0: i32, %arg1: i32, %arg2: memref<8x128xf32, #tpu.memory_space<vmem>>, %arg3: memref<8x128xf32, #tpu.memory_space<vmem>>, %arg4: memref<8x128xf32, #tpu.memory_space<vmem>>, %arg5: memref<8x128xf32, #tpu.memory_space<vmem>>, %arg6: memref<8x128xf32, #tpu.memory_space<vmem>>) attributes {dimension_semantics = [#tpu.dimension_semantics<parallel>, #tpu.dimension_semantics<arbitrary>], iteration_bounds = array<i64: 2, 1>, scalar_prefetch = 0 : i64, scratch_operands = 1 : i64, tpu.core_type = #tpu.core_type<tc>, window_params = [{transform_indices = @transform_0, window_bounds = array<i64: 8, 128>}, {transform_indices = @transform_1, window_bounds = array<i64: 8, 128>}, {transform_indices = @transform_2, window_bounds = array<i64: 8, 128>}, {transform_indices = @transform_3, window_bounds = array<i64: 8, 128>}]} {
    %c0_i32 = arith.constant 0 : i32
    %0 = arith.cmpi eq, %arg1, %c0_i32 : i32
    %1 = arith.extui %0 : i1 to i32
    %c0_i32_0 = arith.constant 0 : i32
    %2 = arith.cmpi ne, %1, %c0_i32_0 : i32
    scf.if %2 {
      %cst_16 = arith.constant 0.000000e+00 : f32
      %23 = vector.broadcast %cst_16 : f32 to vector<8x128xf32>
      %c0_17 = arith.constant 0 : index
      %c0_18 = arith.constant 0 : index
      %24 = vector.load %arg6[%c0_17, %c0_18] : memref<8x128xf32, #tpu.memory_space<vmem>>, vector<8x128xf32>
      tpu.vector_store %arg6[%c0_17, %c0_18], %23 {strides = array<i32>} : memref<8x128xf32, #tpu.memory_space<vmem>>, vector<8x128xf32>,
    } else {
    }
    %c0 = arith.constant 0 : index
    %c0_1 = arith.constant 0 : index
    %3 = vector.load %arg4[%c0, %c0_1] : memref<8x128xf32, #tpu.memory_space<vmem>>, vector<8x128xf32>
    %c0_2 = arith.constant 0 : index
    %c0_3 = arith.constant 0 : index
    %4 = vector.load %arg2[%c0_2, %c0_3] : memref<8x128xf32, #tpu.memory_space<vmem>>, vector<8x128xf32>
    %5 = arith.subf %4, %3 : vector<8x128xf32>
    %6 = math.absf %5 : vector<8x128xf32>
    %c0_4 = arith.constant 0 : index
    %c0_5 = arith.constant 0 : index
    %7 = vector.load %arg3[%c0_4, %c0_5] : memref<8x128xf32, #tpu.memory_space<vmem>>, vector<8x128xf32>
    %8 = arith.subf %7, %3 : vector<8x128xf32>
    %9 = math.absf %8 : vector<8x128xf32>
    %c0_6 = arith.constant 0 : index
    %c0_7 = arith.constant 0 : index
    %10 = vector.load %arg6[%c0_6, %c0_7] : memref<8x128xf32, #tpu.memory_space<vmem>>, vector<1x128xf32>
    %cst = arith.constant dense<0.000000e+00> : vector<128xf32>
    %11 = vector.multi_reduction <add>, %6, %cst [0] : vector<8x128xf32> to vector<128xf32>
    %12 = vector.shape_cast %11 : vector<128xf32> to vector<1x128xf32>
    %13 = arith.addf %10, %12 : vector<1x128xf32>
    %c0_8 = arith.constant 0 : index
    %c0_9 = arith.constant 0 : index
    %14 = vector.load %arg6[%c0_8, %c0_9] : memref<8x128xf32, #tpu.memory_space<vmem>>, vector<1x128xf32>
    tpu.vector_store %arg6[%c0_8, %c0_9], %13 {strides = array<i32>} : memref<8x128xf32, #tpu.memory_space<vmem>>, vector<1x128xf32>,
    %c1 = arith.constant 1 : index
    %c0_10 = arith.constant 0 : index
    %15 = vector.load %arg6[%c1, %c0_10] : memref<8x128xf32, #tpu.memory_space<vmem>>, vector<1x128xf32>
    %cst_11 = arith.constant dense<0.000000e+00> : vector<128xf32>
    %16 = vector.multi_reduction <add>, %9, %cst_11 [0] : vector<8x128xf32> to vector<128xf32>
    %17 = vector.shape_cast %16 : vector<128xf32> to vector<1x128xf32>
    %18 = arith.addf %15, %17 : vector<1x128xf32>
    %c1_12 = arith.constant 1 : index
    %c0_13 = arith.constant 0 : index
    %19 = vector.load %arg6[%c1_12, %c0_13] : memref<8x128xf32, #tpu.memory_space<vmem>>, vector<1x128xf32>
    tpu.vector_store %arg6[%c1_12, %c0_13], %18 {strides = array<i32>} : memref<8x128xf32, #tpu.memory_space<vmem>>, vector<1x128xf32>,
    %c0_i32_14 = arith.constant 0 : i32
    %20 = arith.cmpi eq, %arg1, %c0_i32_14 : i32
    %21 = arith.extui %20 : i1 to i32
    %c0_i32_15 = arith.constant 0 : i32
    %22 = arith.cmpi ne, %21, %c0_i32_15 : i32
    scf.if %22 {
      %c0_16 = arith.constant 0 : index
      %c0_17 = arith.constant 0 : index
      %23 = vector.load %arg6[%c0_16, %c0_17] : memref<8x128xf32, #tpu.memory_space<vmem>>, vector<1x128xf32>
      %24 = vector.shape_cast %23 : vector<1x128xf32> to vector<1x1x128xf32>
      %cst_18 = arith.constant dense<0.000000e+00> : vector<1xf32>
      %25 = vector.multi_reduction <add>, %24, %cst_18 [1, 2] : vector<1x1x128xf32> to vector<1xf32>
      %26 = vector.shape_cast %25 : vector<1xf32> to vector<1x1x1xf32>
      %27 = vector.extract %26[0, 0, 0] : f32 from vector<1x1x1xf32>
      %c1_19 = arith.constant 1 : index
      %c0_20 = arith.constant 0 : index
      %28 = vector.load %arg6[%c1_19, %c0_20] : memref<8x128xf32, #tpu.memory_space<vmem>>, vector<1x128xf32>
      %29 = vector.shape_cast %28 : vector<1x128xf32> to vector<1x1x128xf32>
      %cst_21 = arith.constant dense<0.000000e+00> : vector<1xf32>
      %30 = vector.multi_reduction <add>, %29, %cst_21 [1, 2] : vector<1x1x128xf32> to vector<1xf32>
      %31 = vector.shape_cast %30 : vector<1xf32> to vector<1x1x1xf32>
      %32 = vector.extract %31[0, 0, 0] : f32 from vector<1x1x1xf32>
      %33 = tpu.iota {dimensions = array<i32: 1>} : vector<8x128xi32>
      %c0_i32_22 = arith.constant 0 : i32
      %34 = vector.broadcast %c0_i32_22 : i32 to vector<8x128xi32>
      %35 = arith.cmpi eq, %33, %34 : vector<8x128xi32>
      %c1_i32 = arith.constant 1 : i32
      %36 = vector.broadcast %c1_i32 : i32 to vector<8x128xi32>
      %37 = arith.cmpi eq, %33, %36 : vector<8x128xi32>
      %cst_23 = arith.constant 0.000000e+00 : f32
      %38 = vector.broadcast %32 : f32 to vector<8x128xf32>
      %39 = vector.broadcast %cst_23 : f32 to vector<8x128xf32>
      %40 = arith.select %37, %38, %39 : vector<8x128xi1>, vector<8x128xf32>
      %41 = vector.broadcast %27 : f32 to vector<8x128xf32>
      %42 = arith.select %35, %41, %40 : vector<8x128xi1>, vector<8x128xf32>
      %c0_24 = arith.constant 0 : index
      %c0_25 = arith.constant 0 : index
      %43 = vector.load %arg5[%c0_24, %c0_25] : memref<8x128xf32, #tpu.memory_space<vmem>>, vector<8x128xf32>
      tpu.vector_store %arg5[%c0_24, %c0_25], %42 {strides = array<i32>} : memref<8x128xf32, #tpu.memory_space<vmem>>, vector<8x128xf32>,
    } else {
    }
    return
  }
  func.func @transform_0(%arg0: i32, %arg1: i32) -> (i32, i32) {
    %c1_i32 = arith.constant 1 : i32
    %0 = arith.muli %arg0, %c1_i32 : i32
    %1 = arith.addi %0, %arg1 : i32
    %c0_i32 = arith.constant 0 : i32
    %c0_i32_0 = arith.constant 0 : i32
    return %1, %c0_i32 : i32, i32
  }
  func.func @transform_1(%arg0: i32, %arg1: i32) -> (i32, i32) {
    %c1_i32 = arith.constant 1 : i32
    %0 = arith.muli %arg0, %c1_i32 : i32
    %1 = arith.addi %0, %arg1 : i32
    %c0_i32 = arith.constant 0 : i32
    %c0_i32_0 = arith.constant 0 : i32
    return %1, %c0_i32 : i32, i32
  }
  func.func @transform_2(%arg0: i32, %arg1: i32) -> (i32, i32) {
    %c1_i32 = arith.constant 1 : i32
    %0 = arith.muli %arg0, %c1_i32 : i32
    %1 = arith.addi %0, %arg1 : i32
    %c0_i32 = arith.constant 0 : i32
    %c0_i32_0 = arith.constant 0 : i32
    return %1, %c0_i32 : i32, i32
  }
  func.func @transform_3(%arg0: i32, %arg1: i32) -> (i32, i32) {
    %c0_i32 = arith.constant 0 : i32
    %c0_i32_0 = arith.constant 0 : i32
    return %arg0, %c0_i32 : i32, i32
  }
}

module attributes {stable_mosaic.version = 11 : i64} {
  func.func @_stop_bce_kernel(%arg0: i32, %arg1: memref<8x128xf32, #tpu.memory_space<vmem>>, %arg2: memref<8x128xf32, #tpu.memory_space<vmem>>, %arg3: memref<8x128xf32, #tpu.memory_space<vmem>>) attributes {dimension_semantics = [#tpu.dimension_semantics<arbitrary>], iteration_bounds = array<i64: 1>, scalar_prefetch = 0 : i64, scratch_operands = 0 : i64, tpu.core_type = #tpu.core_type<tc>, window_params = [{pipeline_mode = #tpu.pipeline_mode<synchronous>, transform_indices = @transform_0, window_bounds = array<i64: 8, 128>}, {pipeline_mode = #tpu.pipeline_mode<synchronous>, transform_indices = @transform_1, window_bounds = array<i64: 8, 128>}, {pipeline_mode = #tpu.pipeline_mode<synchronous>, transform_indices = @transform_2, window_bounds = array<i64: 8, 128>}]} {
    %c0 = arith.constant 0 : index
    %c0_0 = arith.constant 0 : index
    %0 = vector.load %arg1[%c0, %c0_0] : memref<8x128xf32, #tpu.memory_space<vmem>>, vector<8x128xf32>
    %c0_1 = arith.constant 0 : index
    %c0_2 = arith.constant 0 : index
    %1 = vector.load %arg2[%c0_1, %c0_2] : memref<8x128xf32, #tpu.memory_space<vmem>>, vector<8x128xf32>
    %2 = tpu.iota {dimensions = array<i32: 0>} : vector<8x128xi32>
    %3 = tpu.iota {dimensions = array<i32: 1>} : vector<8x128xi32>
    %c128_i32 = arith.constant 128 : i32
    %4 = vector.broadcast %c128_i32 : i32 to vector<8x128xi32>
    %5 = arith.muli %2, %4 : vector<8x128xi32>
    %6 = arith.addi %5, %3 : vector<8x128xi32>
    %cst = arith.constant 0.000000e+00 : f32
    %7 = vector.broadcast %cst : f32 to vector<8x128xf32>
    %8 = arith.maximumf %0, %7 : vector<8x128xf32>
    %9 = arith.mulf %0, %1 : vector<8x128xf32>
    %10 = arith.subf %8, %9 : vector<8x128xf32>
    %11 = math.absf %0 : vector<8x128xf32>
    %cst_3 = arith.constant 0.000000e+00 : f32
    %12 = vector.broadcast %cst_3 : f32 to vector<8x128xf32>
    %13 = arith.subf %12, %11 : vector<8x128xf32>
    %14 = math.exp %13 : vector<8x128xf32>
    %15 = math.log1p %14 : vector<8x128xf32>
    %16 = arith.addf %10, %15 : vector<8x128xf32>
    %c32_i32 = arith.constant 32 : i32
    %17 = vector.broadcast %c32_i32 : i32 to vector<8x128xi32>
    %18 = arith.cmpi slt, %6, %17 : vector<8x128xi32>
    %cst_4 = arith.constant 0.000000e+00 : f32
    %19 = vector.broadcast %cst_4 : f32 to vector<8x128xf32>
    %20 = arith.select %18, %16, %19 : vector<8x128xi1>, vector<8x128xf32>
    %21 = vector.shape_cast %20 : vector<8x128xf32> to vector<1x8x128xf32>
    %cst_5 = arith.constant dense<0.000000e+00> : vector<1xf32>
    %22 = vector.multi_reduction <add>, %21, %cst_5 [1, 2] : vector<1x8x128xf32> to vector<1xf32>
    %23 = vector.shape_cast %22 : vector<1xf32> to vector<1x1x1xf32>
    %24 = vector.extract %23[0, 0, 0] : f32 from vector<1x1x1xf32>
    %25 = tpu.iota {dimensions = array<i32: 1>} : vector<8x128xi32>
    %c0_i32 = arith.constant 0 : i32
    %26 = vector.broadcast %c0_i32 : i32 to vector<8x128xi32>
    %27 = arith.cmpi eq, %25, %26 : vector<8x128xi32>
    %cst_6 = arith.constant 0.000000e+00 : f32
    %28 = vector.broadcast %24 : f32 to vector<8x128xf32>
    %29 = vector.broadcast %cst_6 : f32 to vector<8x128xf32>
    %30 = arith.select %27, %28, %29 : vector<8x128xi1>, vector<8x128xf32>
    %c0_7 = arith.constant 0 : index
    %c0_8 = arith.constant 0 : index
    %31 = vector.load %arg3[%c0_7, %c0_8] : memref<8x128xf32, #tpu.memory_space<vmem>>, vector<8x128xf32>
    tpu.vector_store %arg3[%c0_7, %c0_8], %30 {strides = array<i32>} : memref<8x128xf32, #tpu.memory_space<vmem>>, vector<8x128xf32>,
    return
  }
  func.func @transform_0(%arg0: i32) -> (i32, i32) {
    %c0_i32 = arith.constant 0 : i32
    %c0_i32_0 = arith.constant 0 : i32
    %c0_i32_1 = arith.constant 0 : i32
    return %c0_i32, %c0_i32_0 : i32, i32
  }
  func.func @transform_1(%arg0: i32) -> (i32, i32) {
    %c0_i32 = arith.constant 0 : i32
    %c0_i32_0 = arith.constant 0 : i32
    %c0_i32_1 = arith.constant 0 : i32
    return %c0_i32, %c0_i32_0 : i32, i32
  }
  func.func @transform_2(%arg0: i32) -> (i32, i32) {
    %c0_i32 = arith.constant 0 : i32
    %c0_i32_0 = arith.constant 0 : i32
    %c0_i32_1 = arith.constant 0 : i32
    return %c0_i32, %c0_i32_0 : i32, i32
  }
}

</mosaic_0001>

<bundles_post_ra>
// kernel: squeeze.6
= control target key start
LH: loop header
LB: loop body
LE: loop exit
PB: predicated region body
PF: predicated region fallthrough
CT: control target
= control target key end

     0   :  { %vm7_vm0 = vcmask 130048   ;;  %vm13_vm1 = vcmask 261248   ;;  %s39_s0 = inlined_call_operand.vmem [shape: f32[2,16], index: 0, kind: input, shape index: {}]   ;;  %s40_s1 = inlined_call_operand.vmem [shape: f32[32], index: 1, kind: output, shape index: {}]  }
   0x1   :  { %v4_v0 = vld [vmem:[%s39_s0] sm:$0x3]  ;;  %s22_s0 = smov 16  }
   0x2   :  { %5 = vst [vmem:[#allocation1] sm:$0x3] %v4_v0 }
   0x9   :  { %v10_v1 = vld [vmem:[#allocation1 + $0x1] sm:$0x1]   ;;  %v6_v2 = vld [vmem:[#allocation1] sm:$0x1]  }
   0xa   :  { %11 = vrot.lane.b32.xlu0 %v10_v1, %s22_s0  ;;  %8 = vst.msk [vmem:[#allocation0] sm:$0x1] %vm7_vm0, %v6_v2  }
  0x7c   :  { %v12_v3 = vpop.permute.xlu0 %11  }
  0x7d   :  { %14 = vst.msk [vmem:[#allocation0] sm:$0x1] %vm13_vm1, %v12_v3  }
  0x84   :  { %v18_v4 = vld [vmem:[#allocation0] sm:$0x1] }
  0x85   :  { %20 = vst [vmem:[%s40_s1] sm:$0x1] %v18_v4 }

// kernel: stutter_tts_loss.2
= control target key start
LH: loop header
LB: loop body
LE: loop exit
PB: predicated region body
PF: predicated region fallthrough
CT: control target
= control target key end

     0   :  { %s468_s12 = smov 0   ;;  %s470_s13 = smov 0   ;;  %s513_s0 = inlined_call_operand.vmem [shape: f32[16,128], index: 0, kind: input, shape index: {}]   ;;  %s514_s1 = inlined_call_operand.vmem [shape: f32[16,128], index: 1, kind: input, shape index: {}]   ;;  %s515_s2 = inlined_call_operand.vmem [shape: f32[16,128], index: 2, kind: input, shape index: {}]   ;;  %s516_s3 = inlined_call_operand.vmem [shape: f32[16,128], index: 3, kind: output, shape index: {}]  }
   0x1   :  { %s472_s14 = smov 0  }
   0x2 LB: > { %s25_s15 = sadd.s32 1, %s441_s13  ;;  %p387_p0 = scmp.ge.s32.totalorder %s445_s14, 1  ;;  %s445_s14 = sphi %s472_s14, %s13_s14   ;;  %s441_s13 = sphi %s470_s13, %s518_s13   ;;  %s437_s12 = sphi %s468_s12, %s517_s12  }
   0x3   : > { %p27_p1 = scmp.ge.s32.totalorder %s25_s15, 2  ;;  %p178_p2 = scmp.lt.s32.totalorder %s445_s14, 3 }
   0x5   : > { %s520_s15 = smov (%p27_p1, %s25_s15), 0  ;;  %p179_p3 = pnand %p387_p0, %p178_p2 }
   0x6   : > { %p212_p4 = scmp.lt.s32.totalorder (!%p179_p3), %s437_s12, 1  ;;  %v447_v0 = vmov (!%p179_p3), 0.0   ;;  %vm267_vm0 = vcmask (!%p179_p3), 1040384   ;;  %v289_v42 = vlaneseq (!%p179_p3) }
   0x7   : > { %182 = sbr.rel (%p179_p3) target bundleno = 258 (0x102), region = 32  ;;  %237 = vst [vmem:[#allocation2] sm:$0xff] (!%p179_p3), %v447_v0 }
   0x8   : > { %v290_v43 = vand.u32 (!%p179_p3), 127, %v289_v42 }
   0xa   : > { %vm292_vm1 = vcmp.eq.s32.totalorder (!%p179_p3), %v290_v43, 1  ;;  %vm291_vm2 = vcmp.eq.s32.totalorder (!%p179_p3), %v290_v43, 0 }
   0xe   : > { %s522_s12 = smov (!%p212_p4, %s437_s12), 1  ;;  %v245_v17 = vld [vmem:[#allocation2] sm:$0x1]  ;;  %v254_v20 = vld [vmem:[#allocation2 + $0x1] sm:$0x1] }
   0xf   : > { %s486_s16 = sshll.u32 %s522_s12, 3 }
  0x10   : > { %s215_s19 = scalar_lea.vmem %s513_s0, %s486_s16  ;;  %s227_s22 = scalar_lea.vmem %s515_s2, %s486_s16 }
  0x11   : > { %v238_v1 = vld [vmem:[%s227_s22] sm:$0xff]  ;;  %s221_s25 = scalar_lea.vmem %s514_s1, %s486_s16  ;;  %s232_s30 = scalar_lea.vmem %s516_s3, %s486_s16 }
  0x12   : > { %v239_v2 = vld [vmem:[%s215_s19] sm:$0xff] }
  0x13   : > { %v240_v3 = vsub.f32 %v239_v2, %v238_v1  ;;  %v242_v4 = vld [vmem:[%s221_s25] sm:$0xff] }
  0x14   : > { %v243_v5 = vsub.f32 %v242_v4, %v238_v1 }
  0x15   : > { %v241_v6 = vand.u32 2147483647, %v240_v3 }
  0x16   : > { %v244_v7 = vand.u32 2147483647, %v243_v5 }
  0x17   : > { %v246_v8 = vrot.slane %v241_v6, 4 }
  0x18   : > { %v255_v9 = vrot.slane %v244_v7, 4 }
  0x19   : > { %v247_v10 = vadd.f32 %v246_v8, %v241_v6 }
  0x1a   : > { %v256_v11 = vadd.f32 %v255_v9, %v244_v7 }
  0x1b   : > { %v248_v12 = vrot.slane %v247_v10, 2 }
  0x1c   : > { %v257_v13 = vrot.slane %v256_v11, 2 }
  0x1d   : > { %v249_v14 = vadd.f32 %v248_v12, %v247_v10 }
  0x1e   : > { %v258_v15 = vadd.f32 %v257_v13, %v256_v11 }
  0x1f   : > { %v250_v16 = vrot.slane %v249_v14, 1 }
  0x20   : > { %v259_v18 = vrot.slane %v258_v15, 1 }
  0x21   : > { %v251_v19 = vadd.f32 %v250_v16, %v249_v14 }
  0x22   : > { %v260_v21 = vadd.f32 %v259_v18, %v258_v15 }
  0x23   : > { %v252_v22 = vadd.f32 %v251_v19, %v245_v17 }
  0x24   : > { %v261_v23 = vadd.f32 %v260_v21, %v254_v20 }
  0x25   : > { %253 = vst [vmem:[#allocation2] sm:$0x1] %v252_v22 }
  0x26   : > { %262 = vst [vmem:[#allocation2 + $0x1] sm:$0x1] %v261_v23 }
  0x2c   : > { %v266_v24 = vld [vmem:[#allocation2] sm:$0x1] }
  0x2d   : > { %v268_v25 = vsel %vm267_vm0, %v266_v24, 0.0  ;;  %v278_v26 = vld [vmem:[#allocation2 + $0x1] sm:$0x1] }
  0x2e   : > { %269 = vadd.xlane.f32.xlu0 %v268_v25  ;;  %v279_v27 = vsel %vm267_vm0, %v278_v26, 0.0 }
  0x32   : > { %280 = vadd.xlane.f32.xlu0 %v279_v27 }
  0xbb   : > { %v270_v28 = vpop.xlane.xlu0 %269 }
  0xbc   : > { %v271_v29 = vrot.slane %v270_v28, 4 }
  0xbe   : > { %v272_v30 = vadd.f32 %v271_v29, %v270_v28 }
  0xbf   : > { %v281_v31 = vpop.xlane.xlu0 %280 }
  0xc0   : > { %v273_v32 = vrot.slane %v272_v30, 2  ;;  %v282_v33 = vrot.slane %v281_v31, 4 }
  0xc2   : > { %v283_v34 = vadd.f32 %v282_v33, %v281_v31  ;;  %v274_v35 = vadd.f32 %v273_v32, %v272_v30 }
  0xc4   : > { %v284_v36 = vrot.slane %v283_v34, 2  ;;  %v275_v37 = vrot.slane %v274_v35, 1 }
  0xc6   : > { %v285_v38 = vadd.f32 %v284_v36, %v283_v34  ;;  %v276_v39 = vadd.f32 %v275_v37, %v274_v35 }
  0xc8   : > { %394 = vpush %v276_v39  ;;  %v286_v40 = vrot.slane %v285_v38, 1 }
  0xca   : > { %v287_v41 = vadd.f32 %v286_v40, %v285_v38 }
  0xcc   : > { %396 = vpush %v287_v41 }
  0xf9   : > { %s395_s26 = spop %394 }
  0xfa   : > { %v295_v45 = vstv %s395_s26 }
  0xfd   : > { %s397_s27 = spop %396 }
  0xfe   : > { %v293_v44 = vstv %s397_s27 }
  0xff   : > { %v294_v46 = vsel %vm292_vm1, %v293_v44, 0.0 }
 0x100   : > { %v296_v47 = vsel %vm291_vm2, %v295_v45, %v294_v46 }
 0x101   : > { %297 = vst [vmem:[%s232_s30] sm:$0xff] %v296_v47 }
 0x102 PF: > { %s13_s14 = sadd.s32 1, %s445_s14   ;;  %s517_s12 = smov %s441_s13 }
 0x103   : > { %p10_p5 = scmp.ge.s32.totalorder %s13_s14, 4   ;;  %s518_s13 = smov %s520_s15 }
 0x105   :  { %12 = sbr.rel (!%p10_p5) target bundleno = 2 (0x2), region = 76 }

// kernel: stutter_tts_loss.3
= control target key start
LH: loop header
LB: loop body
LE: loop exit
PB: predicated region body
PF: predicated region fallthrough
CT: control target
= control target key end

     0   :  { %v13_v5 = vlaneseq  ;;  %s85_s0 = inlined_call_operand.vmem [shape: f32[8,128], index: 0, kind: input, shape index: {}]   ;;  %s86_s1 = inlined_call_operand.vmem [shape: f32[8,128], index: 1, kind: input, shape index: {}]   ;;  %s87_s2 = inlined_call_operand.vmem [shape: f32[8,128], index: 2, kind: output, shape index: {}]  }
   0x1   :  { %v11_v0 = vld [vmem:[%s85_s0] sm:$0xff] }
   0x2   :  { %v22_v1 = vand.u32 2147483647, %v11_v0  ;;  %v14_v7 = vshrl.u32 %v13_v5, 7  ;;  %v12_v9 = vld [vmem:[%s86_s1] sm:$0xff]  ;;  %v16_v10 = vand.u32 127, %v13_v5  ;;  %v19_v13 = vmax.f32 %v11_v0, 0.0 }
   0x3   :  { %v20_v14 = vmul.f32 %v12_v9, %v11_v0 }
   0x4   :  { %v23_v2 = vsub.f32 0.0, %v22_v1  ;;  %v17_v11 = vmul.u32 128, %v14_v7  ;;  %vm47_vm2 = vcmp.eq.s32.totalorder %v16_v10, 0 }
   0x5   :  { %v21_v19 = vsub.f32 %v19_v13, %v20_v14 }
   0x6   :  { %v24_v3 = vmul.f32 1.442695, %v23_v2  ;;  %v18_v16 = vadd.s32 %v17_v11, %v16_v10 }
   0x8   :  { %57 = vpow2.f32 %v24_v3  ;;  %vm36_vm1 = vcmp.lt.s32.totalorder %v18_v16, 32 }
  0x12   :  { %v58_v4 = vpop.eup %57 }
  0x13   :  { %v26_v6 = vadd.f32 1.0, %v58_v4  ;;  %v29_v8 = vmul.f32 -0.5, %v58_v4  ;;  %v32_v15 = vand.u32 2147483647, %v58_v4 }
  0x15   :  { %59 = vlog2.f32 %v26_v6  ;;  %v30_v12 = vadd.f32 1.0, %v29_v8  ;;  %vm33_vm0 = vcmp.lt.f32.partialorder %v32_v15, 0.0004427343 }
  0x17   :  { %v31_v17 = vmul.f32 %v58_v4, %v30_v12 }
  0x1f   :  { %v60_v18 = vpop.eup %59 }
  0x20   :  { %v28_v20 = vmul.f32 0.6931472, %v60_v18 }
  0x22   :  { %v34_v21 = vsel %vm33_vm0, %v31_v17, %v28_v20 }
  0x23   :  { %v35_v22 = vadd.f32 %v34_v21, %v21_v19 }
  0x25   :  { %v37_v23 = vsel %vm36_vm1, %v35_v22, 0.0 }
  0x26   :  { %38 = vadd.xlane.f32.xlu0 %v37_v23 }
  0xb3   :  { %v39_v24 = vpop.xlane.xlu0 %38 }
  0xb4   :  { %v40_v25 = vrot.slane %v39_v24, 4 }
  0xb6   :  { %v41_v26 = vadd.f32 %v40_v25, %v39_v24 }
  0xb8   :  { %v42_v27 = vrot.slane %v41_v26, 2 }
  0xba   :  { %v43_v28 = vadd.f32 %v42_v27, %v41_v26 }
  0xbc   :  { %v44_v29 = vrot.slane %v43_v28, 1 }
  0xbe   :  { %v45_v30 = vadd.f32 %v44_v29, %v43_v28 }
  0xc0   :  { %55 = vpush %v45_v30 }
  0xf1   :  { %s56_s0 = spop %55 }
  0xf2   :  { %v48_v31 = vstv %s56_s0 }
  0xf3   :  { %v49_v32 = vsel %vm47_vm2, %v48_v31, 0.0 }
  0xf4   :  { %50 = vst [vmem:[%s87_s2] sm:$0xff] %v49_v32 }

</bundles_post_ra>
